<compile_context>
chip_gen: v7x
topology: tpu7x:2x2x1
jax: 0.10.0
libtpu: 0.0.40
codegen_flags: <defaults>
</compile_context>

<pallas_src>
import functools

import jax
import jax.numpy as jnp
from jax.experimental import pallas as pl
from jax.experimental.pallas import tpu as pltpu

_LANE = 128
_DEFAULT_BLOCK_ROWS = 8192  # 8192 * 128 * 4B = 4 MiB per f32 block; 8 MiB double-buffered.


def _round_up(x, m):
    return ((x + m - 1) // m) * m


def _neutral_pad_value(gan_mode, target_is_real):
    """Value whose per-element loss is exactly 0 for the given mode/target."""
    if gan_mode in ("vanilla", "lsgan"):
        return 1.0 if target_is_real else 0.0
    if gan_mode == "wgan":
        return 0.0
    raise ValueError(f"Unsupported GAN mode: {gan_mode}")


def _elementwise_loss(x, gan_mode, target_is_real):
    """Per-element loss in f32 (x must already be f32)."""
    if gan_mode == "vanilla":
        # nn.BCELoss: input is a probability; PyTorch clamps the log terms at -100.
        logv = jnp.log(x) if target_is_real else jnp.log(1.0 - x)
        return -jnp.maximum(logv, -100.0)
    if gan_mode == "lsgan":
        t = 1.0 if target_is_real else 0.0
        d = x - t
        return d * d
    if gan_mode == "wgan":
        return -x if target_is_real else x
    raise ValueError(f"Unsupported GAN mode: {gan_mode}")


def _adv_loss_kernel(x_ref, out_ref, *, gan_mode, target_is_real, pad_val,
                     valid_rows_last):
    block_rows = x_ref.shape[0]

    def compute(x):
        loss = _elementwise_loss(x, gan_mode, target_is_real)
        # (block_rows, 128) -> (block_rows//8, 8, 128): groups whole (8,128) vreg tiles,
        # so the reduce is pure VPU adds (no cross-lane XLU work) and the (8,128) output
        # store is an unmasked, tile-aligned vst.
        out_ref[...] = jnp.sum(loss.reshape(-1, 8, _LANE), axis=0)

    if valid_rows_last == block_rows:
        # Every block is full: no masking anywhere (static branch).
        compute(x_ref[...].astype(jnp.float32))
    else:
        i = pl.program_id(0)
        last = pl.num_programs(0) - 1

        @pl.when(i != last)
        def _():
            compute(x_ref[...].astype(jnp.float32))

        @pl.when(i == last)
        def _():
            x = x_ref[...].astype(jnp.float32)
            row = jax.lax.broadcasted_iota(jnp.int32, x.shape, 0)
            # Neutralize the ragged tail rows (Pallas block padding) with a
            # loss-neutral value so they contribute exactly 0 to the partial sum.
            x = jnp.where(row < valid_rows_last, x, pad_val)
            compute(x)


def adversarial_loss(discriminator_output, target_is_real, gan_mode="vanilla",
                     block_rows=_DEFAULT_BLOCK_ROWS):
    """Forward pass of AdversarialLoss. target_is_real and gan_mode are static."""
    x = jnp.asarray(discriminator_output).reshape(-1)
    n = x.shape[0]
    if n == 0:
        raise ValueError("discriminator_output must be non-empty")
    target_is_real = bool(target_is_real)
    pad_val = _neutral_pad_value(gan_mode, target_is_real)

    # Split off the (<128-element) ragged lane tail so the bulk of the input can be
    # viewed as (rows, 128) with a free reshape — no wrapper-side pad/copy of the input.
    n_main = (n // _LANE) * _LANE
    tail_sum = jnp.float32(0.0)
    if n_main != n:
        tail = x[n_main:].astype(jnp.float32)
        tail_sum = jnp.sum(_elementwise_loss(tail, gan_mode, target_is_real))

    if n_main == 0:
        # Whole input is smaller than one lane row; kernel not worth dispatching.
        return tail_sum / n

    rows = n_main // _LANE
    x2 = x[:n_main].reshape(rows, _LANE)  # contiguous reshape: no copy

    # Dtype-aware sublane multiple: 8 for f32, 16 for bf16, 32 for int8/fp8.
    packing = max(1, 4 // jnp.dtype(x.dtype).itemsize)
    sublane_mult = 8 * packing

    # Cap block_rows so big inputs always split into >= 2 parallel chunks (keeps both
    # v7x TensorCores busy); never below one sublane tile.
    block_rows = max(sublane_mult,
                     min(_round_up(block_rows, sublane_mult),
                         _round_up(pl.cdiv(rows, 2), sublane_mult)))
    num_chunks = pl.cdiv(rows, block_rows)
    valid_rows_last = rows - (num_chunks - 1) * block_rows

    kernel = functools.partial(
        _adv_loss_kernel,
        gan_mode=gan_mode,
        target_is_real=target_is_real,
        pad_val=pad_val,
        valid_rows_last=valid_rows_last,
    )

    partials = pl.pallas_call(
        kernel,
        out_shape=jax.ShapeDtypeStruct((num_chunks * 8, _LANE), jnp.float32),
        grid=(num_chunks,),
        in_specs=[pl.BlockSpec((block_rows, _LANE), lambda i: (i, 0))],
        out_specs=pl.BlockSpec((8, _LANE), lambda i: (i, 0)),
        compiler_params=pltpu.CompilerParams(
            dimension_semantics=("parallel",),  # independent chunks -> megacore on v7x
            vmem_limit_bytes=32 * 1024 * 1024,  # 4 MiB blocks double-buffered fit easily
        ),
    )(x2)

    # TODO(synk): for tiny inputs the trailing jnp.sum dispatch could be folded into the
    # kernel (arbitrary grid + scratch accumulator); kept as parallel partials to
    # preserve v7x megacore scaling and f32 accumulation accuracy.
    return (jnp.sum(partials) + tail_sum) / n


def _reference(x, target_is_real, gan_mode):
    x = jnp.asarray(x).astype(jnp.float32)
    if gan_mode == "vanilla":
        logv = jnp.log(x) if target_is_real else jnp.log(1.0 - x)
        return jnp.mean(-jnp.maximum(logv, -100.0))
    if gan_mode == "lsgan":
        t = 1.0 if target_is_real else 0.0
        return jnp.mean((x - t) ** 2)
    if gan_mode == "wgan":
        return -jnp.mean(x) if target_is_real else jnp.mean(x)
    raise ValueError(gan_mode)


if __name__ == "__main__":
    key = jax.random.PRNGKey(0)
    # Discriminator outputs (e.g. PatchGAN maps) passed through sigmoid so they lie in
    # (0, 1) as BCELoss requires. Shapes exercise: exact multiple of 128, ragged lane
    # tail, and a ragged last block with 2 chunks.
    shapes = [(2, 1, 16, 16), (3, 1, 7, 11), (2, 3, 20, 20)]

    ok = True
    for idx, shape in enumerate(shapes):
        k = jax.random.fold_in(key, idx)
        disc_out = jax.nn.sigmoid(jax.random.normal(k, shape, dtype=jnp.float32))
        for mode in ("vanilla", "lsgan", "wgan"):
            for target_is_real in (True, False):
                got = jax.block_until_ready(
                    adversarial_loss(disc_out, target_is_real, mode))
                want = _reference(disc_out, target_is_real, mode)
                if not jnp.allclose(got, want, rtol=1e-5, atol=1e-5):
                    ok = False
                    print(f"MISMATCH shape={shape} mode={mode} real={target_is_real}: "
                          f"{got} vs {want}")

    if ok:
        print("KERNEL_OK")
</pallas_src>

<mosaic_0001>
module attributes {stable_mosaic.version = 11 : i64} {
  func.func @_adv_loss_kernel(%arg0: i32, %arg1: memref<8x128xf32, #tpu.memory_space<vmem>>, %arg2: memref<8x128xf32, #tpu.memory_space<vmem>>) attributes {dimension_semantics = [#tpu.dimension_semantics<parallel>], iteration_bounds = array<i64: 1>, scalar_prefetch = 0 : i64, scratch_operands = 0 : i64, tpu.core_type = #tpu.core_type<tc>, window_params = [{transform_indices = @transform_0, window_bounds = array<i64: 8, 128>}, {transform_indices = @transform_1, window_bounds = array<i64: 8, 128>}]} {
    %c0_i32 = arith.constant 0 : i32
    %0 = arith.cmpi ne, %arg0, %c0_i32 : i32
    %1 = arith.extui %0 : i1 to i32
    %c0_i32_0 = arith.constant 0 : i32
    %2 = arith.cmpi ne, %1, %c0_i32_0 : i32
    scf.if %2 {
      %c0 = arith.constant 0 : index
      %c0_3 = arith.constant 0 : index
      %6 = vector.load %arg1[%c0, %c0_3] : memref<8x128xf32, #tpu.memory_space<vmem>>, vector<8x128xf32>
      %7 = math.log %6 : vector<8x128xf32>
      %cst = arith.constant -1.000000e+02 : f32
      %8 = vector.broadcast %cst : f32 to vector<8x128xf32>
      %9 = arith.maximumf %7, %8 : vector<8x128xf32>
      %cst_4 = arith.constant 0.000000e+00 : f32
      %10 = vector.broadcast %cst_4 : f32 to vector<8x128xf32>
      %11 = arith.subf %10, %9 : vector<8x128xf32>
      %12 = vector.shape_cast %11 : vector<8x128xf32> to vector<1x8x128xf32>
      %cst_5 = arith.constant dense<0.000000e+00> : vector<8x128xf32>
      %13 = vector.multi_reduction <add>, %12, %cst_5 [0] : vector<1x8x128xf32> to vector<8x128xf32>
      %c0_6 = arith.constant 0 : index
      %c0_7 = arith.constant 0 : index
      %14 = vector.load %arg2[%c0_6, %c0_7] : memref<8x128xf32, #tpu.memory_space<vmem>>, vector<8x128xf32>
      tpu.vector_store %arg2[%c0_6, %c0_7], %13 {strides = array<i32>} : memref<8x128xf32, #tpu.memory_space<vmem>>, vector<8x128xf32>,
    } else {
    }
    %c0_i32_1 = arith.constant 0 : i32
    %3 = arith.cmpi eq, %arg0, %c0_i32_1 : i32
    %4 = arith.extui %3 : i1 to i32
    %c0_i32_2 = arith.constant 0 : i32
    %5 = arith.cmpi ne, %4, %c0_i32_2 : i32
    scf.if %5 {
      %c0 = arith.constant 0 : index
      %c0_3 = arith.constant 0 : index
      %6 = vector.load %arg1[%c0, %c0_3] : memref<8x128xf32, #tpu.memory_space<vmem>>, vector<8x128xf32>
      %7 = tpu.iota {dimensions = array<i32: 0>} : vector<8x128xi32>
      %c4_i32 = arith.constant 4 : i32
      %8 = vector.broadcast %c4_i32 : i32 to vector<8x128xi32>
      %9 = arith.cmpi slt, %7, %8 : vector<8x128xi32>
      %cst = arith.constant 1.000000e+00 : f32
      %10 = vector.broadcast %cst : f32 to vector<8x128xf32>
      %11 = arith.select %9, %6, %10 : vector<8x128xi1>, vector<8x128xf32>
      %12 = math.log %11 : vector<8x128xf32>
      %cst_4 = arith.constant -1.000000e+02 : f32
      %13 = vector.broadcast %cst_4 : f32 to vector<8x128xf32>
      %14 = arith.maximumf %12, %13 : vector<8x128xf32>
      %cst_5 = arith.constant 0.000000e+00 : f32
      %15 = vector.broadcast %cst_5 : f32 to vector<8x128xf32>
      %16 = arith.subf %15, %14 : vector<8x128xf32>
      %17 = vector.shape_cast %16 : vector<8x128xf32> to vector<1x8x128xf32>
      %cst_6 = arith.constant dense<0.000000e+00> : vector<8x128xf32>
      %18 = vector.multi_reduction <add>, %17, %cst_6 [0] : vector<1x8x128xf32> to vector<8x128xf32>
      %c0_7 = arith.constant 0 : index
      %c0_8 = arith.constant 0 : index
      %19 = vector.load %arg2[%c0_7, %c0_8] : memref<8x128xf32, #tpu.memory_space<vmem>>, vector<8x128xf32>
      tpu.vector_store %arg2[%c0_7, %c0_8], %18 {strides = array<i32>} : memref<8x128xf32, #tpu.memory_space<vmem>>, vector<8x128xf32>,
    } else {
    }
    return
  }
  func.func @transform_0(%arg0: i32) -> (i32, i32) {
    %c0_i32 = arith.constant 0 : i32
    %c0_i32_0 = arith.constant 0 : i32
    return %arg0, %c0_i32 : i32, i32
  }
  func.func @transform_1(%arg0: i32) -> (i32, i32) {
    %c0_i32 = arith.constant 0 : i32
    %c0_i32_0 = arith.constant 0 : i32
    return %arg0, %c0_i32 : i32, i32
  }
}

</mosaic_0001>

<bundles_post_ra>
// kernel: tpu_custom_call.1
= control target key start
LH: loop header
LB: loop body
LE: loop exit
PB: predicated region body
PF: predicated region fallthrough
CT: control target
= control target key end

     0   :  { %6 = vsyncpa [#allocation3], 0  ;;  %s156_s0 = inlined_call_operand.hbm [shape: f32[4,128], index: 0, kind: input, shape index: {}]   ;;  %s157_s1 = inlined_call_operand.hbm [shape: f32[8,128], index: 1, kind: output, shape index: {}]  }
   0x1   :  { %7 = vsyncpa [#allocation4], 0 }
   0x2   :  { %12 = vsyncadd [#allocation3], 64  ;;  %s118_s6 = smov [#allocation2]   ;;  %s70_s10 = scalar_lea.hbm %s156_s0, 64 }
   0x3   :  { %s13_s7 = sshll.u32 %s118_s6, 4  ;;  %p71_p0 = scmp.ne.s32.totalorder %s156_s0, %s70_s10  ;;  %s14_s7 = int_to_ptr.vmem [resolvable:$true] %s13_s7 }
   0x4   :  { %p74_p1 = scmp.lt.u32.totalorder %s70_s10, %s156_s0 }
   0x6   :  { %p76_p2 = pnand %p74_p1, %p71_p0 }
   0x8   :  { %79 = shalt.err (!%p76_p2)
}
   0x9   :  { %s80_s15 = scalar_lea.vmem %s14_s7, 64  ;;  %s84_s16 = scalar_lea.vmem %s14_s7, 128 }
   0xa   :  { %p81_p3 = scmp.ne.s32.totalorder %s14_s7, %s80_s15  ;;  %p85_p4 = scmp.lt.s32.totalorder %s14_s7, %s14_s7 }
   0xb   :  { %p86_p5 = scmp.lt.s32.totalorder %s84_s16, %s80_s15 }
   0xd   :  { %p87_p6 = por %p86_p5, %p85_p4 }
   0xf   :  { %p88_p7 = pnand %p87_p6, %p81_p3 }
  0x11   :  { %91 = shalt.err (!%p88_p7)
}
  0x12   :  { %s119_s17 = smov 64   ;;  %s120_s18 = smov 4  }
  0x13   :  { %19 = dma.hbm_to_vmem [thread:$0]  %s156_s0, 64, %s14_s7, [#allocation3], %s119_s17, %s119_s17, %s120_s18  }
  0x14   :  { %114 = dma.done.wait [#allocation3], 128  }
  0x15   :  { %115 = vsyncadd [#allocation3], 4294967168  ;;  %v39_v0 = vlaneseq  ;;  %v38_v2 = vld [vmem:[#allocation2] sm:$0xff]  ;;  %s121_s21 = smov [#allocation5]  }
  0x16   :  { %s55_s22 = sshll.u32 %s121_s21, 4  ;;  %s56_s22 = int_to_ptr.vmem [resolvable:$true] %s55_s22 }
  0x17   :  { %v40_v1 = vshrl.u32 %v39_v0, 7  ;;  %s92_s23 = scalar_lea.vmem %s56_s22, 128  ;;  %p97_p9 = scmp.lt.s32.totalorder %s56_s22, %s56_s22 }
  0x18   :  { %p93_p8 = scmp.ne.s32.totalorder %s56_s22, %s92_s23  ;;  %p98_p10 = scmp.lt.s32.totalorder %s92_s23, %s92_s23 }
  0x19   :  { %vm41_vm0 = vcmp.lt.s32.totalorder %v40_v1, 4 }
  0x1a   :  { %v42_v3 = vsel %vm41_vm0, %v38_v2, 1.0  ;;  %p99_p11 = por %p98_p10, %p97_p9 }
  0x1b   :  { %68 = vlog2.f32 %v42_v3 }
  0x1c   :  { %p100_p12 = pnand %p99_p11, %p93_p8 }
  0x25   :  { %v69_v4 = vpop.eup %68 }
  0x26   :  { %v44_v5 = vmul.f32 0.6931472, %v69_v4 }
  0x28   :  { %v45_v6 = vmax.f32 %v44_v5, -100.0 }
  0x2a   :  { %v46_v7 = vsub.f32 0.0, %v45_v6 }
  0x2c   :  { %48 = vst [vmem:[#allocation5] sm:$0xff] %v46_v7 }
  0x2d   :  { %103 = shalt.err (!%p100_p12)
}
  0x2e   :  { %s104_s25 = scalar_lea.hbm %s157_s1, 128 }
  0x2f   :  { %p105_p13 = scmp.ne.s32.totalorder %s157_s1, %s104_s25  ;;  %p108_p0 = scmp.lt.u32.totalorder %s104_s25, %s157_s1 }
  0x31   :  { %p110_p1 = pnand %p108_p0, %p105_p13 }
  0x33   :  { %113 = shalt.err (!%p110_p1)
}
  0x34   :  { %58 = dma.vmem_to_hbm [thread:$0]  %s56_s22, 128, %s157_s1, [#allocation4]  }
  0x35   :  { %116 = dma.done.wait [#allocation4], 128  }
  0x36   :  { %117 = vsyncadd [#allocation4], 4294967168 }
  0x37   :  { %62 = vsyncpa [#allocation3], 1 }
  0x38   :  { %63 = vsyncpa [#allocation4], 1 }

</bundles_post_ra>
